<compile_context>
chip_gen: v7x
topology: tpu7x:2x2x1
jax: 0.10.0
libtpu: 0.0.40
codegen_flags: <defaults>
</compile_context>

<pallas_src>
import jax
import jax.numpy as jnp
from jax.experimental import pallas as pl
from jax.experimental.pallas import tpu as pltpu


def _round_up(a: int, m: int) -> int:
    return (a + m - 1) // m * m


# ---------------------------------------------------------------------------
# Kernel: one (K, TB) batch tile of the transposed problem.
# ---------------------------------------------------------------------------
def _qlinear_kernel(qp_ref, w_ref, cs_ref, x_ref, o_ref):
    """qp_ref : SMEM f32[5] = [inv_s_in, z_in, s_out, inv_s_out, z_out]
       w_ref  : VMEM bf16 (N, K)  int4 weight codes in [-8, 7]   (grid-resident)
       cs_ref : VMEM f32  (N, 1)  s_in * w_scale per out channel (grid-resident)
       x_ref  : VMEM f32  (K, TB) transposed activations (lane-dense load)
       o_ref  : VMEM f32  (N, TB) transposed output      (lane-dense store)"""
    inv_s_in, z_in = qp_ref[0], qp_ref[1]
    s_out, inv_s_out, z_out = qp_ref[2], qp_ref[3], qp_ref[4]

    # Static int8 asymmetric per-tensor input fake-quant, scale folded out:
    # feed exact integer codes (q - z) to the MXU.
    x = x_ref[...]
    x_q = jnp.clip(jnp.round(x * inv_s_in) + z_in, 0.0, 255.0) - z_in  # ints in [-255, 255]

    # Integer-valued operands are exact in bf16 and the MXU accumulates in f32,
    # so this is bit-identical to an f32 contraction while using the native
    # bf16 MXU (no f32 emulation).
    y = jnp.dot(w_ref[...], x_q.astype(jnp.bfloat16),
                preferred_element_type=jnp.float32)                    # (N, TB)

    # Apply folded scales once on the small accumulator: s_in * w_scale[n].
    y = y * cs_ref[...]

    # Static int8 asymmetric per-tensor output fake-quant.
    y_q = jnp.clip(jnp.round(y * inv_s_out) + z_out, 0.0, 255.0)
    o_ref[...] = (y_q - z_out) * s_out


# ---------------------------------------------------------------------------
# Wrapper: batch grid, transposed (lane-dense) layout, resident weight.
# ---------------------------------------------------------------------------
def quantized_linear(x, w_codes, out_ch_scale, qparams, *, max_block_b=512):
    """x: (B, K) f32 -> (B, N) f32 (QuantizedLinear.forward, static quantizers).

    w_codes      : (N, K) bf16 integer weight codes in [-8, 7]
    out_ch_scale : (N, 1) f32  = s_in * per-channel weight scale
    qparams      : (5,)   f32  = [inv_s_in, z_in, s_out, inv_s_out, z_out]
    """
    B, K = x.shape
    N = w_codes.shape[0]

    # Tokens are packed along lanes (transposed layout): TB is a multiple of
    # 128, capped at 512 rows per tile (>=512-row blocks hit ~85% of roofline).
    tb = min(max_block_b, _round_up(B, 128))
    b_pad = _round_up(B, tb)
    x_t = jnp.pad(x.T, ((0, 0), (0, b_pad - B)))            # (K, B_pad), layout plumbing

    grid = (b_pad // tb,)
    y_t = pl.pallas_call(
        _qlinear_kernel,
        out_shape=jax.ShapeDtypeStruct((N, b_pad), jnp.float32),
        grid=grid,
        in_specs=[
            pl.BlockSpec(memory_space=pltpu.MemorySpace.SMEM),   # qparams f32[5]
            pl.BlockSpec((N, K), lambda i: (0, 0)),              # weight, resident across tiles
            pl.BlockSpec((N, 1), lambda i: (0, 0)),              # per-channel scale, resident
            pl.BlockSpec((K, tb), lambda i: (0, i)),             # activation batch tile
        ],
        out_specs=pl.BlockSpec((N, tb), lambda i: (0, i)),       # lane-dense (tb % 128 == 0)
        compiler_params=pltpu.CompilerParams(
            dimension_semantics=("parallel",)),                  # v7x: 2 TCs split batch tiles
    )(qparams, w_codes, out_ch_scale, x_t)

    return y_t[:, :B].T                                          # (B, N)


# ---------------------------------------------------------------------------
# Static (init/calibration-time) preprocessing — hoisted out of the kernel.
# ---------------------------------------------------------------------------
def quantize_weight_int4_per_channel(w):
    """int4 symmetric per-output-channel quantization of an (N, K) weight.
    Returns integer codes (exact in bf16, in [-8, 7]) and per-channel scale (N, 1)."""
    w = w.astype(jnp.float32)
    w_scale = jnp.max(jnp.abs(w), axis=-1, keepdims=True) / 7.0
    w_scale = jnp.where(w_scale == 0.0, 1.0, w_scale)            # guard all-zero rows
    w_codes = jnp.clip(jnp.round(w / w_scale), -8.0, 7.0)
    return w_codes.astype(jnp.bfloat16), w_scale


def asym_int8_stats(v):
    """Static per-tensor asymmetric int8 (q in [0, 255]) min/max range setting."""
    vmin = jnp.minimum(jnp.min(v), 0.0)
    vmax = jnp.maximum(jnp.max(v), 0.0)
    scale = (vmax - vmin) / 255.0
    scale = jnp.where(scale == 0.0, 1.0, scale)                  # guard all-zero tensors
    offset = jnp.round(-vmin / scale)
    return scale.astype(jnp.float32), offset.astype(jnp.float32)


def make_qparams(s_in, z_in, s_out, z_out):
    return jnp.stack([1.0 / s_in, z_in, s_out, 1.0 / s_out, z_out]).astype(jnp.float32)


def reference_forward(x, w_codes, w_scale, s_in, z_in, s_out, z_out):
    """Pure-JAX reference with the same factored math as the kernel."""
    x_q = jnp.clip(jnp.round(x * (1.0 / s_in)) + z_in, 0.0, 255.0) - z_in
    y = (x_q @ w_codes.astype(jnp.float32).T) * (s_in * w_scale[:, 0])
    y_q = jnp.clip(jnp.round(y * (1.0 / s_out)) + z_out, 0.0, 255.0)
    return (y_q - z_out) * s_out


if __name__ == "__main__":
    key = jax.random.PRNGKey(0)
    kx, kw = jax.random.split(key)

    B, K, N = 2, 16, 8                          # batch, in_features, out_features
    x = jax.random.normal(kx, (B, K), dtype=jnp.float32)
    bound = 1.0 / (K ** 0.5)                    # stand-in for kaiming-uniform init
    w = jax.random.uniform(kw, (N, K), dtype=jnp.float32, minval=-bound, maxval=bound)

    # Static weight quantization (once, outside the kernel).
    w_codes, w_scale = quantize_weight_int4_per_channel(w)

    # Static activation quantizers: calibrate input on x, output on the
    # quantized forward path, then freeze.
    s_in, z_in = asym_int8_stats(x)
    x_fq = (jnp.clip(jnp.round(x / s_in) + z_in, 0.0, 255.0) - z_in) * s_in
    y_calib = x_fq @ (w_codes.astype(jnp.float32) * w_scale).T
    s_out, z_out = asym_int8_stats(y_calib)

    qparams = make_qparams(s_in, z_in, s_out, z_out)
    out_ch_scale = (s_in * w_scale).astype(jnp.float32)          # (N, 1)

    out = quantized_linear(x, w_codes, out_ch_scale, qparams)
    jax.block_until_ready(out)

    ref = reference_forward(x, w_codes, w_scale, s_in, z_in, s_out, z_out)
    assert out.shape == (B, N) and out.dtype == jnp.float32
    assert bool(jnp.all(jnp.isfinite(out)))
    assert bool(jnp.allclose(out, ref, atol=1e-5, rtol=1e-5)), (out, ref)
    print("KERNEL_OK")
</pallas_src>

<mosaic_0001>
module attributes {stable_mosaic.version = 11 : i64} {
  func.func @_qlinear_kernel(%arg0: i32, %arg1: memref<5xf32, #tpu.memory_space<smem>>, %arg2: memref<8x16xbf16, #tpu.memory_space<vmem>>, %arg3: memref<8x1xf32, #tpu.memory_space<vmem>>, %arg4: memref<16x128xf32, #tpu.memory_space<vmem>>, %arg5: memref<8x128xf32, #tpu.memory_space<vmem>>) attributes {dimension_semantics = [#tpu.dimension_semantics<parallel>], iteration_bounds = array<i64: 1>, scalar_prefetch = 0 : i64, scratch_operands = 0 : i64, tpu.core_type = #tpu.core_type<tc>, window_params = [{transform_indices = @transform_0, window_bounds = array<i64: 5>}, {pipeline_mode = #tpu.pipeline_mode<synchronous>, transform_indices = @transform_1, window_bounds = array<i64: 8, 16>}, {pipeline_mode = #tpu.pipeline_mode<synchronous>, transform_indices = @transform_2, window_bounds = array<i64: 8, 1>}, {transform_indices = @transform_3, window_bounds = array<i64: 16, 128>}, {transform_indices = @transform_4, window_bounds = array<i64: 8, 128>}]} {
    %c0 = arith.constant 0 : index
    %0 = memref.load %arg1[%c0] : memref<5xf32, #tpu.memory_space<smem>>
    %c1 = arith.constant 1 : index
    %1 = memref.load %arg1[%c1] : memref<5xf32, #tpu.memory_space<smem>>
    %c2 = arith.constant 2 : index
    %2 = memref.load %arg1[%c2] : memref<5xf32, #tpu.memory_space<smem>>
    %c3 = arith.constant 3 : index
    %3 = memref.load %arg1[%c3] : memref<5xf32, #tpu.memory_space<smem>>
    %c4 = arith.constant 4 : index
    %4 = memref.load %arg1[%c4] : memref<5xf32, #tpu.memory_space<smem>>
    %c0_0 = arith.constant 0 : index
    %c0_1 = arith.constant 0 : index
    %5 = vector.load %arg4[%c0_0, %c0_1] : memref<16x128xf32, #tpu.memory_space<vmem>>, vector<16x128xf32>
    %6 = vector.broadcast %0 : f32 to vector<16x128xf32>
    %7 = arith.mulf %5, %6 : vector<16x128xf32>
    %8 = math.roundeven %7 : vector<16x128xf32>
    %9 = vector.broadcast %1 : f32 to vector<16x128xf32>
    %10 = arith.addf %8, %9 : vector<16x128xf32>
    %cst = arith.constant 0.000000e+00 : f32
    %cst_2 = arith.constant 2.550000e+02 : f32
    %11 = vector.broadcast %cst : f32 to vector<16x128xf32>
    %12 = arith.maximumf %11, %10 : vector<16x128xf32>
    %13 = vector.broadcast %cst_2 : f32 to vector<16x128xf32>
    %14 = arith.minimumf %13, %12 : vector<16x128xf32>
    %15 = vector.broadcast %1 : f32 to vector<16x128xf32>
    %16 = arith.subf %14, %15 : vector<16x128xf32>
    %c0_3 = arith.constant 0 : index
    %c0_4 = arith.constant 0 : index
    %17 = vector.load %arg2[%c0_3, %c0_4] : memref<8x16xbf16, #tpu.memory_space<vmem>>, vector<8x16xbf16>
    %18 = arith.truncf %16 : vector<16x128xf32> to vector<16x128xbf16>
    %cst_5 = arith.constant dense<0.000000e+00> : vector<8x128xf32>
    %19 = tpu.matmul %17, %18, %cst_5 {dimension_numbers = #tpu.dot_dimension_numbers<[1], [0], [0], [1], [0, 0, 1, 1], [], []>} : vector<8x16xbf16>, vector<16x128xbf16>, vector<8x128xf32> -> vector<8x128xf32>
    %c0_6 = arith.constant 0 : index
    %c0_7 = arith.constant 0 : index
    %20 = vector.load %arg3[%c0_6, %c0_7] : memref<8x1xf32, #tpu.memory_space<vmem>>, vector<8x1xf32>
    %21 = vector.broadcast %20 : vector<8x1xf32> to vector<8x128xf32>
    %22 = arith.mulf %19, %21 : vector<8x128xf32>
    %23 = vector.broadcast %3 : f32 to vector<8x128xf32>
    %24 = arith.mulf %22, %23 : vector<8x128xf32>
    %25 = math.roundeven %24 : vector<8x128xf32>
    %26 = vector.broadcast %4 : f32 to vector<8x128xf32>
    %27 = arith.addf %25, %26 : vector<8x128xf32>
    %cst_8 = arith.constant 0.000000e+00 : f32
    %cst_9 = arith.constant 2.550000e+02 : f32
    %28 = vector.broadcast %cst_8 : f32 to vector<8x128xf32>
    %29 = arith.maximumf %28, %27 : vector<8x128xf32>
    %30 = vector.broadcast %cst_9 : f32 to vector<8x128xf32>
    %31 = arith.minimumf %30, %29 : vector<8x128xf32>
    %32 = vector.broadcast %4 : f32 to vector<8x128xf32>
    %33 = arith.subf %31, %32 : vector<8x128xf32>
    %34 = vector.broadcast %2 : f32 to vector<8x128xf32>
    %35 = arith.mulf %33, %34 : vector<8x128xf32>
    %c0_10 = arith.constant 0 : index
    %c0_11 = arith.constant 0 : index
    %36 = vector.load %arg5[%c0_10, %c0_11] : memref<8x128xf32, #tpu.memory_space<vmem>>, vector<8x128xf32>
    tpu.vector_store %arg5[%c0_10, %c0_11], %35 {strides = array<i32>} : memref<8x128xf32, #tpu.memory_space<vmem>>, vector<8x128xf32>,
    return
  }
  func.func @transform_0(%arg0: i32) -> i32 {
    %c0_i32 = arith.constant 0 : i32
    %c0_i32_0 = arith.constant 0 : i32
    return %c0_i32 : i32
  }
  func.func @transform_1(%arg0: i32) -> (i32, i32) {
    %c0_i32 = arith.constant 0 : i32
    %c0_i32_0 = arith.constant 0 : i32
    %c0_i32_1 = arith.constant 0 : i32
    return %c0_i32, %c0_i32_0 : i32, i32
  }
  func.func @transform_2(%arg0: i32) -> (i32, i32) {
    %c0_i32 = arith.constant 0 : i32
    %c0_i32_0 = arith.constant 0 : i32
    %c0_i32_1 = arith.constant 0 : i32
    return %c0_i32, %c0_i32_0 : i32, i32
  }
  func.func @transform_3(%arg0: i32) -> (i32, i32) {
    %c0_i32 = arith.constant 0 : i32
    %c0_i32_0 = arith.constant 0 : i32
    return %c0_i32, %arg0 : i32, i32
  }
  func.func @transform_4(%arg0: i32) -> (i32, i32) {
    %c0_i32 = arith.constant 0 : i32
    %c0_i32_0 = arith.constant 0 : i32
    return %c0_i32, %arg0 : i32, i32
  }
}

</mosaic_0001>

<bundles_post_ra>
// kernel: tpu_custom_call.1
= control target key start
LH: loop header
LB: loop body
LE: loop exit
PB: predicated region body
PF: predicated region fallthrough
CT: control target
= control target key end

     0   :  { %9 = vsyncpa [#allocation4], 0  ;;  %s254_s0 = inlined_call_operand.hbm [shape: f32[5], index: 0, kind: input, shape index: {}]   ;;  %s255_s1 = inlined_call_operand.vmem [shape: bf16[8,16], index: 1, kind: input, shape index: {}]   ;;  %s256_s2 = inlined_call_operand.vmem [shape: f32[8,1], index: 2, kind: input, shape index: {}]   ;;  %s257_s3 = inlined_call_operand.vmem [shape: f32[16,128], index: 3, kind: input, shape index: {}]   ;;  %s258_s4 = inlined_call_operand.hbm [shape: f32[8,128], index: 4, kind: output, shape index: {}]  }
   0x1   :  { %10 = vsyncpa [#allocation3], 0  ;;  %s152_s17 = scalar_lea.hbm %s254_s0, 16 }
   0x2   :  { %p153_p0 = scmp.ne.s32.totalorder %s254_s0, %s152_s17  ;;  %p156_p1 = scmp.lt.u32.totalorder %s152_s17, %s254_s0 }
   0x4   :  { %p158_p2 = pnand %p156_p1, %p153_p0 }
   0x6   :  { %161 = shalt.err (!%p158_p2)
}
   0x7   :  { %s188_s22 = smov [#allocation2]  }
   0x8   :  { %18 = dma.hbm_to_smem %s254_s0, 16, %s188_s22, [#allocation4]  }
   0x9   :  { %184 = dma.done.wait [#allocation4], 16  }
   0xa   :  { %185 = vsyncadd [#allocation4], 4294967280 }
   0xb   :  { %28 = sfence }
   0xc   :  { %s30_s25 = sld [smem:[#allocation2]]  ;;  %s130_s26 = sld [smem:[#allocation2 + $0x1]]  ;;  %v189_v0 = vmov 0.0   ;;  %vm190_vm0 = vmmov 0   ;;  %v191_v1 = vmov 0   ;;  %v97_v2 = vld [vmem:[%s256_s2] sm:$0xff] }
   0xd   :  { %137 = vmatprep.subr.bf16.mxu0 %v189_v0  ;;  %139 = vmatprep.mubr.msk.bf16.mxu0 %vm190_vm0, %v189_v0  ;;  %v35_v3 = vld [vmem:[%s257_s3] sm:$0xff]  ;;  %v36_v4 = vld [vmem:[%s257_s3 + $0x8] sm:$0xff]  ;;  %vm53_vm1 = vcmask 130048   ;;  %s132_s3 = sld [smem:[#allocation2 + $0x3]]  ;;  %s133_s7 = sld [smem:[#allocation2 + $0x4]] }
   0xe   :  { %151 = vset.pattern.permute.xlu0 %v191_v1  ;;  %v51_v20 = vld [vmem:[%s255_s1] sm:$0xf]  ;;  %s131_s8 = sld [smem:[#allocation2 + $0x2]]  ;;  %s192_s1 = smov [#allocation5]  }
   0xf   :  { %100 = vperm.xlu0 %151, %v97_v2   ;;  %s121_s9 = sshll.u32 %s192_s1, 4  ;;  %s122_s9 = int_to_ptr.vmem [resolvable:$true] %s121_s9 }
  0x10   :  { %s162_s10 = scalar_lea.vmem %s122_s9, 128  ;;  %p167_p4 = scmp.lt.s32.totalorder %s122_s9, %s122_s9 }
  0x11   :  { %p163_p3 = scmp.ne.s32.totalorder %s122_s9, %s162_s10  ;;  %p168_p5 = scmp.lt.s32.totalorder %s162_s10, %s162_s10 }
  0x12   :  { %v37_v5 = vstv %s30_s25  ;;  %v42_v8 = vstv %s130_s26 }
  0x13   :  { %v38_v6 = vmul.f32 %v37_v5, %v35_v3  ;;  %v39_v7 = vmul.f32 %v37_v5, %v36_v4  ;;  %v104_v23 = vstv %s132_s3  ;;  %v107_v29 = vstv %s133_s7  ;;  %p169_p6 = por %p168_p5, %p167_p4 }
  0x14   :  { %v112_v34 = vstv %s131_s8 }
  0x15   :  { %v143_v9 = vround.rtne.f32 %v38_v6  ;;  %v144_v10 = vround.rtne.f32 %v39_v7  ;;  %p170_p7 = pnand %p169_p6, %p163_p3 }
  0x17   :  { %v43_v11 = vadd.f32 %v143_v9, %v42_v8  ;;  %v44_v12 = vadd.f32 %v144_v10, %v42_v8 }
  0x19   :  { %v45_v13 = vmax.f32 %v43_v11, 0.0  ;;  %v46_v14 = vmax.f32 %v44_v12, 0.0 }
  0x1b   :  { %v47_v15 = vmin.f32 %v45_v13, 255.0  ;;  %v48_v16 = vmin.f32 %v46_v14, 255.0 }
  0x1d   :  { %v49_v17 = vsub.f32 %v47_v15, %v42_v8  ;;  %v50_v18 = vsub.f32 %v48_v16, %v42_v8 }
  0x1f   :  { %v52_v19 = vpack.c.bf16 %v50_v18, %v49_v17 }
  0x21   :  { %138 = vmatpush3.bf16.msra.mxu0 %v52_v19 }
  0x24   :  { %140 = vmatmul.mubr.msk.bf16.vlgmr.msra.gmra.mrb[0].mxu0 %vm53_vm1, %v51_v20 }
  0x8e   :  { %v101_v21 = vpop.permute.xlu0 %100 }
  0xf7   :  { %v91_v22 = vpop.f32.mrb[0].mxu0 }
  0xf8   :  { %v103_v24 = vmul.f32 %v101_v21, %v91_v22  ;;  %v141_v25 = vpop.f32.mrb[1].mxu0 }
  0xf9   :  { %v94_v26 = vpop.f32.mrb[2].mxu0 }
  0xfa   :  { %v105_v27 = vmul.f32 %v104_v23, %v103_v24  ;;  %v142_v28 = vpop.f32.mrb[3].mxu0 }
  0xfc   :  { %v145_v30 = vround.rtne.f32 %v105_v27 }
  0xfe   :  { %v108_v31 = vadd.f32 %v145_v30, %v107_v29 }
 0x100   :  { %v109_v32 = vmax.f32 %v108_v31, 0.0 }
 0x102   :  { %v110_v33 = vmin.f32 %v109_v32, 255.0 }
 0x104   :  { %v111_v35 = vsub.f32 %v110_v33, %v107_v29 }
 0x106   :  { %v113_v36 = vmul.f32 %v112_v34, %v111_v35 }
 0x108   :  { %114 = vst [vmem:[#allocation5] sm:$0xff] %v113_v36 }
 0x109   :  { %173 = shalt.err (!%p170_p7)
}
 0x10a   :  { %s174_s13 = scalar_lea.hbm %s258_s4, 128 }
 0x10b   :  { %p175_p8 = scmp.ne.s32.totalorder %s258_s4, %s174_s13  ;;  %p178_p9 = scmp.lt.u32.totalorder %s174_s13, %s258_s4 }
 0x10d   :  { %p180_p10 = pnand %p178_p9, %p175_p8 }
 0x10f   :  { %183 = shalt.err (!%p180_p10)
}
 0x110   :  { %124 = dma.vmem_to_hbm [thread:$0]  %s122_s9, 128, %s258_s4, [#allocation3]  }
 0x111   :  { %186 = dma.done.wait [#allocation3], 128  }
 0x112   :  { %187 = vsyncadd [#allocation3], 4294967168 }
 0x113   :  { %128 = vsyncpa [#allocation3], 1 }
 0x114   :  { %129 = vsyncpa [#allocation4], 1 }

</bundles_post_ra>
